<compile_context>
chip_gen: v7x
topology: tpu7x:2x2x1
jax: 0.10.0
libtpu: 0.0.40
codegen_flags: <defaults>
</compile_context>

<pallas_src>
import functools
import math

import jax
import jax.numpy as jnp
from jax import lax
from jax.experimental import pallas as pl
from jax.experimental.pallas import tpu as pltpu


_SQRT1_2 = 1.0 / math.sqrt(2.0)
_VMEM_LIMIT = 48 * 1024 * 1024  # leave headroom on v7x (64 MiB physical)


def _compiler_params(sem):
    return pltpu.CompilerParams(dimension_semantics=sem, vmem_limit_bytes=_VMEM_LIMIT)


def _fit_lane(dim, target):
    """Largest tile <= target that divides dim and is a multiple of 128, else full dim."""
    t = target
    while t >= 128:
        if dim % t == 0:
            return t
        t //= 2
    return dim


def _fit_sub(dim, target):
    """Largest tile <= target that divides dim and is a multiple of 8, else full dim."""
    t = target
    while t >= 8:
        if dim % t == 0:
            return t
        t //= 2
    return dim


def _pick_heads_per_step(heads, d):
    """Smallest head group whose lane width (hp*d) is a multiple of 128 (lane-dense stores)."""
    for hp in range(1, heads + 1):
        if heads % hp == 0 and (hp * d) % 128 == 0:
            return hp
    return heads  # tiny configs: full H block (equal-to-full-dim is always legal)


# ----------------------------- tiled linear (+bias, +GELU) -----------------------------

def _linear_kernel(x_ref, w_ref, b_ref, o_ref, acc_ref, *, activation):
    @pl.when(pl.program_id(2) == 0)
    def _():
        acc_ref[...] = jnp.zeros_like(acc_ref)

    acc_ref[...] += jnp.dot(x_ref[...], w_ref[...], preferred_element_type=jnp.float32)

    @pl.when(pl.program_id(2) == pl.num_programs(2) - 1)
    def _():
        y = acc_ref[...] + b_ref[...]
        if activation == "gelu":  # exact (erf) GELU as in HF DeBERTa
            y = 0.5 * y * (1.0 + lax.erf(y * _SQRT1_2))
        o_ref[...] = y.astype(o_ref.dtype)


def linear(x, w, b, activation="none", out_dtype=jnp.bfloat16):
    """y = act(x @ w + b); bf16 operands, f32 accumulation."""
    M, K = x.shape
    Kw, N = w.shape
    assert K == Kw
    tm = _fit_sub(M, 256)
    tn = _fit_lane(N, 512)
    tk = _fit_lane(K, 512)
    grid = (M // tm, N // tn, K // tk)
    return pl.pallas_call(
        functools.partial(_linear_kernel, activation=activation),
        out_shape=jax.ShapeDtypeStruct((M, N), out_dtype),
        grid=grid,
        in_specs=[pl.BlockSpec((tm, tk), lambda i, j, k: (i, k)),
                  pl.BlockSpec((tk, tn), lambda i, j, k: (k, j)),
                  pl.BlockSpec((1, tn), lambda i, j, k: (0, j))],
        out_specs=pl.BlockSpec((tm, tn), lambda i, j, k: (i, j)),
        scratch_shapes=[pltpu.VMEM((tm, tn), jnp.float32)],
        compiler_params=_compiler_params(("parallel", "parallel", "arbitrary")),
    )(x.astype(jnp.bfloat16), w.astype(jnp.bfloat16), b.reshape(1, N).astype(jnp.float32))


# ----------------------------- row-tiled LayerNorm (+fused residual) -----------------------------

def _ln_kernel(x_ref, g_ref, b_ref, o_ref, *, eps):
    x = x_ref[...].astype(jnp.float32)
    mean = jnp.mean(x, axis=-1, keepdims=True)
    xc = x - mean
    var = jnp.mean(xc * xc, axis=-1, keepdims=True)
    o_ref[...] = (xc * lax.rsqrt(var + eps) * g_ref[...] + b_ref[...]).astype(o_ref.dtype)


def _ln_res_kernel(x_ref, r_ref, g_ref, b_ref, o_ref, *, eps):
    x = x_ref[...].astype(jnp.float32) + r_ref[...].astype(jnp.float32)
    mean = jnp.mean(x, axis=-1, keepdims=True)
    xc = x - mean
    var = jnp.mean(xc * xc, axis=-1, keepdims=True)
    o_ref[...] = (xc * lax.rsqrt(var + eps) * g_ref[...] + b_ref[...]).astype(o_ref.dtype)


def layernorm(x, g, b, residual=None, eps=1e-7, out_dtype=jnp.bfloat16):
    M, H = x.shape
    tm = _fit_sub(M, 512)
    grid = (M // tm,)
    row_spec = pl.BlockSpec((tm, H), lambda i: (i, 0))
    gb_spec = pl.BlockSpec((1, H), lambda i: (0, 0))
    if residual is None:
        return pl.pallas_call(
            functools.partial(_ln_kernel, eps=eps),
            out_shape=jax.ShapeDtypeStruct((M, H), out_dtype),
            grid=grid,
            in_specs=[row_spec, gb_spec, gb_spec],
            out_specs=row_spec,
            compiler_params=_compiler_params(("parallel",)),
        )(x, g.reshape(1, H), b.reshape(1, H))
    return pl.pallas_call(
        functools.partial(_ln_res_kernel, eps=eps),
        out_shape=jax.ShapeDtypeStruct((M, H), out_dtype),
        grid=grid,
        in_specs=[row_spec, row_spec, gb_spec, gb_spec],
        out_specs=row_spec,
        compiler_params=_compiler_params(("parallel",)),
    )(x, residual, g.reshape(1, H), b.reshape(1, H))


# ----------------------------- disentangled c2p / p2c raw scores -----------------------------

def _relscore_kernel(q_ref, k_ref, pk_ref, pq_ref, c2p_ref, p2c_ref, *, hp):
    dn = (((1,), (1,)), ((), ()))  # contract the d axis of both operands (no transpose)
    for h in range(hp):
        q = q_ref[0, h]            # (S, d) bf16
        k = k_ref[0, h]
        c2p_ref[0, h] = lax.dot_general(
            q, pk_ref[h], dn, preferred_element_type=jnp.float32).astype(c2p_ref.dtype)
        p2c_ref[0, h] = lax.dot_general(
            k, pq_ref[h], dn, preferred_element_type=jnp.float32).astype(p2c_ref.dtype)


def rel_scores(q, k, pos_key, pos_query, hp):
    """q,k: (B, heads, S, d); pos_*: (heads, 2span, d)  ->  two (B, heads, S, 2span) bf16."""
    B, heads, S, d = q.shape
    span2 = pos_key.shape[1]
    groups = heads // hp
    spec_qk = pl.BlockSpec((1, hp, S, d), lambda b, g: (b, g, 0, 0))
    spec_pos = pl.BlockSpec((hp, span2, d), lambda b, g: (g, 0, 0))   # shared across batch
    spec_out = pl.BlockSpec((1, hp, S, span2), lambda b, g: (b, g, 0, 0))
    return pl.pallas_call(
        functools.partial(_relscore_kernel, hp=hp),
        out_shape=(jax.ShapeDtypeStruct((B, heads, S, span2), jnp.bfloat16),
                   jax.ShapeDtypeStruct((B, heads, S, span2), jnp.bfloat16)),
        grid=(B, groups),
        in_specs=[spec_qk, spec_qk, spec_pos, spec_pos],
        out_specs=(spec_out, spec_out),
        compiler_params=_compiler_params(("parallel", "parallel")),
    )(q, k, pos_key, pos_query)


# ----------------------------- fused scores + rel-bias + softmax + context -----------------------------

def _attn_kernel(q_ref, k_ref, v_ref, c2p_ref, p2c_ref, o_ref, *, hp, inv_scale):
    # TODO(synk): all-ones attention mask assumed (DebertaModel(input_ids) default); no padding mask.
    dn = (((1,), (1,)), ((), ()))
    outs = []
    for h in range(hp):
        q = q_ref[0, h]  # (S, d) bf16
        k = k_ref[0, h]
        v = v_ref[0, h]
        s = lax.dot_general(q, k, dn, preferred_element_type=jnp.float32)
        s = s + c2p_ref[0, h].astype(jnp.float32)
        s = s + p2c_ref[0, h].astype(jnp.float32).T       # p2c transpose done on-chip
        s = s * inv_scale                                  # 1/sqrt(d * 3) applied once
        m = jnp.max(s, axis=-1, keepdims=True)
        p = jnp.exp(s - m)
        inv_l = pl.reciprocal(jnp.sum(p, axis=-1, keepdims=True), approx=True)
        ctx = jnp.dot(p.astype(v.dtype), v, preferred_element_type=jnp.float32)
        outs.append(ctx * inv_l)
    o_ref[0] = jnp.concatenate(outs, axis=-1).astype(o_ref.dtype)   # lane-dense (S, hp*d)


def attention(q, k, v, c2p_b, p2c_b, hp, inv_scale):
    """Writes the context directly in (B, S, H) layout (head-major along the lane axis)."""
    B, heads, S, d = q.shape
    groups = heads // hp
    H = heads * d
    spec_qkv = pl.BlockSpec((1, hp, S, d), lambda b, g: (b, g, 0, 0))
    spec_bias = pl.BlockSpec((1, hp, S, S), lambda b, g: (b, g, 0, 0))
    out_spec = pl.BlockSpec((1, S, hp * d), lambda b, g: (b, 0, g))
    return pl.pallas_call(
        functools.partial(_attn_kernel, hp=hp, inv_scale=inv_scale),
        out_shape=jax.ShapeDtypeStruct((B, S, H), jnp.bfloat16),
        grid=(B, groups),
        in_specs=[spec_qkv, spec_qkv, spec_qkv, spec_bias, spec_bias],
        out_specs=out_spec,
        compiler_params=_compiler_params(("parallel", "parallel")),
    )(q, k, v, c2p_b, p2c_b)


# ----------------------------- model (glue) -----------------------------

def init_params(key, cfg):
    H, I, V, L = cfg["hidden"], cfg["inter"], cfg["vocab"], cfg["layers"]
    max_rel = cfg["max_rel"]

    def init(k, shape, dtype=jnp.bfloat16):
        return (0.02 * jax.random.normal(k, shape, dtype=jnp.float32)).astype(dtype)

    keys = jax.random.split(key, 2 + L)
    params = {
        "word_emb": init(keys[0], (V, H), jnp.float32),
        "rel_emb": init(keys[1], (2 * max_rel, H), jnp.float32),
        "emb_ln_g": jnp.ones((H,), jnp.float32),
        "emb_ln_b": jnp.zeros((H,), jnp.float32),
        "layers": [],
    }
    for l in range(L):
        ks = jax.random.split(keys[2 + l], 6)
        params["layers"].append({
            # matmul weights stored in bf16 (cast once); biases / LN params in f32
            "in_proj_w":  init(ks[0], (H, 3 * H)),        # no bias in DeBERTa in_proj
            "q_bias":     jnp.zeros((H,), jnp.float32),
            "v_bias":     jnp.zeros((H,), jnp.float32),
            # pos_proj (c2p key, no bias) and pos_q_proj (p2c query, bias) fused: [:, :H] | [:, H:]
            "pos_kq_w":   jnp.concatenate([init(ks[1], (H, H)), init(ks[2], (H, H))], axis=1),
            "pos_kq_b":   jnp.zeros((2 * H,), jnp.float32),
            "attn_out_w": init(ks[3], (H, H)),
            "attn_out_b": jnp.zeros((H,), jnp.float32),
            "attn_ln_g":  jnp.ones((H,), jnp.float32),
            "attn_ln_b":  jnp.zeros((H,), jnp.float32),
            "inter_w":    init(ks[4], (H, I)),
            "inter_b":    jnp.zeros((I,), jnp.float32),
            "out_w":      init(ks[5], (I, H)),
            "out_b":      jnp.zeros((H,), jnp.float32),
            "out_ln_g":   jnp.ones((H,), jnp.float32),
            "out_ln_b":   jnp.zeros((H,), jnp.float32),
        })
    return params


def deberta_layer(h, lp, rel_emb_bf, c2p_idx, p2c_idx, cfg):
    B, S, H = h.shape
    heads = cfg["heads"]
    d = H // heads
    inv_scale = 1.0 / math.sqrt(d * 3)        # scale_factor = 1 + len(["c2p", "p2c"])
    hp = _pick_heads_per_step(heads, d)
    span2 = rel_emb_bf.shape[0]

    x2 = h.reshape(B * S, H)

    # --- QKV projection; q/v per-head biases folded into the matmul epilogue ---
    qb = lp["q_bias"].reshape(heads, d)
    vb = lp["v_bias"].reshape(heads, d)
    qkv_bias = jnp.concatenate([qb, jnp.zeros_like(qb), vb], axis=-1).reshape(3 * H)
    qkv = linear(x2, lp["in_proj_w"], qkv_bias)                     # (B*S, 3H) bf16
    qkv = jnp.transpose(qkv.reshape(B, S, heads, 3, d), (3, 0, 2, 1, 4))  # (3,B,heads,S,d)
    q, k, v = qkv[0], qkv[1], qkv[2]

    # --- relative-position projections (one fused matmul), kept per-head (no batch broadcast) ---
    pos_kq = linear(rel_emb_bf, lp["pos_kq_w"], lp["pos_kq_b"])     # (2span, 2H) bf16
    pos_kq = jnp.transpose(pos_kq.reshape(span2, 2, heads, d), (1, 2, 0, 3))
    pos_key, pos_query = pos_kq[0], pos_kq[1]                       # (heads, 2span, d)

    # --- disentangled c2p / p2c raw scores (Pallas, bf16 outputs) ---
    c2p, p2c = rel_scores(q, k, pos_key, pos_query, hp)             # (B, heads, S, 2span)

    # --- relative-index gather (JAX glue, bf16).
    # TODO(synk): fold this gather into the attention kernel (removes these HBM round trips).
    c2p_b = jnp.take_along_axis(c2p, c2p_idx[None, None], axis=-1)  # (B, heads, S, S)
    p2c_b = jnp.take_along_axis(p2c, p2c_idx[None, None], axis=-1)

    # --- fused scores + rel bias + softmax + context; lane-dense output in (B,S,H) layout ---
    # TODO(synk): flash-style KV tiling for very long S (monolithic (S,S) tile kept here).
    ctx = attention(q, k, v, c2p_b, p2c_b, hp, inv_scale)           # (B, S, H) bf16
    ctx2 = ctx.reshape(B * S, H)

    # --- self-output: dense + fused residual LayerNorm ---
    attn_out = linear(ctx2, lp["attn_out_w"], lp["attn_out_b"])
    attn_out = layernorm(attn_out, lp["attn_ln_g"], lp["attn_ln_b"], residual=x2)

    # --- FFN: dense+GELU, dense, fused residual LayerNorm ---
    inter = linear(attn_out, lp["inter_w"], lp["inter_b"], activation="gelu")
    ffn = linear(inter, lp["out_w"], lp["out_b"])
    out = layernorm(ffn, lp["out_ln_g"], lp["out_ln_b"], residual=attn_out)
    return out.reshape(B, S, H)


def deberta_embedder_forward(params, input_ids, cfg):
    """Equivalent of DebertaEmbedder.forward: returns last hidden state (B, S, H)."""
    B, S = input_ids.shape
    H, max_rel = cfg["hidden"], cfg["max_rel"]

    # Embeddings: word lookup (glue) + LayerNorm (Pallas).  deberta-base:
    # position_biased_input=False, type_vocab_size=0, all-ones attention mask, eval mode.
    emb = jnp.take(params["word_emb"], input_ids, axis=0)           # (B, S, H) f32
    h = layernorm(emb.reshape(B * S, H), params["emb_ln_g"], params["emb_ln_b"]).reshape(B, S, H)

    # Relative positions (build_relative_position: rel[i, j] = i - j), clipped to the window.
    att_span = min(S, max_rel)
    rel_pos = jnp.arange(S)[:, None] - jnp.arange(S)[None, :]
    c2p_idx = jnp.clip(rel_pos + att_span, 0, 2 * att_span - 1).astype(jnp.int32)
    p2c_idx = jnp.clip(-rel_pos + att_span, 0, 2 * att_span - 1).astype(jnp.int32)
    rel_emb_bf = params["rel_emb"][max_rel - att_span: max_rel + att_span].astype(jnp.bfloat16)

    for lp in params["layers"]:
        h = deberta_layer(h, lp, rel_emb_bf, c2p_idx, p2c_idx, cfg)
    return h.astype(jnp.float32)


# ----------------------------- main -----------------------------

if __name__ == "__main__":
    cfg = dict(vocab=100, hidden=32, heads=4, inter=64, layers=2, max_rel=16)

    key = jax.random.PRNGKey(0)
    pkey, ikey = jax.random.split(key)
    params = init_params(pkey, cfg)

    B, S = 2, 8
    input_seq = jax.random.randint(ikey, (B, S), 0, cfg["vocab"], dtype=jnp.int32)

    out = deberta_embedder_forward(params, input_seq, cfg)
    out = jax.block_until_ready(out)

    assert out.shape == (B, S, cfg["hidden"])
    assert jnp.all(jnp.isfinite(out))
    print("KERNEL_OK")
</pallas_src>

<mosaic_0001>
module attributes {stable_mosaic.version = 11 : i64} {
  func.func @_ln_kernel(%arg0: i32, %arg1: memref<16x32xf32, #tpu.memory_space<vmem>>, %arg2: memref<1x32xf32, #tpu.memory_space<vmem>>, %arg3: memref<1x32xf32, #tpu.memory_space<vmem>>, %arg4: memref<16x32xbf16, #tpu.memory_space<vmem>>) attributes {dimension_semantics = [#tpu.dimension_semantics<parallel>], iteration_bounds = array<i64: 1>, scalar_prefetch = 0 : i64, scratch_operands = 0 : i64, tpu.core_type = #tpu.core_type<tc>, window_params = [{transform_indices = @transform_0, window_bounds = array<i64: 16, 32>}, {pipeline_mode = #tpu.pipeline_mode<synchronous>, transform_indices = @transform_1, window_bounds = array<i64: 1, 32>}, {pipeline_mode = #tpu.pipeline_mode<synchronous>, transform_indices = @transform_2, window_bounds = array<i64: 1, 32>}, {transform_indices = @transform_3, window_bounds = array<i64: 16, 32>}]} {
    %c0 = arith.constant 0 : index
    %c0_0 = arith.constant 0 : index
    %0 = vector.load %arg1[%c0, %c0_0] : memref<16x32xf32, #tpu.memory_space<vmem>>, vector<16x32xf32>
    %cst = arith.constant dense<0.000000e+00> : vector<16xf32>
    %1 = vector.multi_reduction <add>, %0, %cst [1] : vector<16x32xf32> to vector<16xf32>
    %2 = vector.shape_cast %1 : vector<16xf32> to vector<16x1xf32>
    %cst_1 = arith.constant 3.200000e+01 : f32
    %3 = vector.broadcast %cst_1 : f32 to vector<16x1xf32>
    %4 = arith.divf %2, %3 : vector<16x1xf32>
    %5 = vector.broadcast %4 : vector<16x1xf32> to vector<16x32xf32>
    %6 = arith.subf %0, %5 : vector<16x32xf32>
    %7 = arith.mulf %6, %6 : vector<16x32xf32>
    %cst_2 = arith.constant dense<0.000000e+00> : vector<16xf32>
    %8 = vector.multi_reduction <add>, %7, %cst_2 [1] : vector<16x32xf32> to vector<16xf32>
    %9 = vector.shape_cast %8 : vector<16xf32> to vector<16x1xf32>
    %cst_3 = arith.constant 3.200000e+01 : f32
    %10 = vector.broadcast %cst_3 : f32 to vector<16x1xf32>
    %11 = arith.divf %9, %10 : vector<16x1xf32>
    %cst_4 = arith.constant 1.000000e-07 : f32
    %12 = vector.broadcast %cst_4 : f32 to vector<16x1xf32>
    %13 = arith.addf %11, %12 : vector<16x1xf32>
    %14 = math.rsqrt %13 : vector<16x1xf32>
    %15 = vector.broadcast %14 : vector<16x1xf32> to vector<16x32xf32>
    %16 = arith.mulf %6, %15 : vector<16x32xf32>
    %c0_5 = arith.constant 0 : index
    %c0_6 = arith.constant 0 : index
    %17 = vector.load %arg2[%c0_5, %c0_6] : memref<1x32xf32, #tpu.memory_space<vmem>>, vector<1x32xf32>
    %18 = vector.broadcast %17 : vector<1x32xf32> to vector<16x32xf32>
    %19 = arith.mulf %16, %18 : vector<16x32xf32>
    %c0_7 = arith.constant 0 : index
    %c0_8 = arith.constant 0 : index
    %20 = vector.load %arg3[%c0_7, %c0_8] : memref<1x32xf32, #tpu.memory_space<vmem>>, vector<1x32xf32>
    %21 = vector.broadcast %20 : vector<1x32xf32> to vector<16x32xf32>
    %22 = arith.addf %19, %21 : vector<16x32xf32>
    %23 = arith.truncf %22 : vector<16x32xf32> to vector<16x32xbf16>
    %c0_9 = arith.constant 0 : index
    %c0_10 = arith.constant 0 : index
    %24 = vector.load %arg4[%c0_9, %c0_10] : memref<16x32xbf16, #tpu.memory_space<vmem>>, vector<16x32xbf16>
    tpu.vector_store %arg4[%c0_9, %c0_10], %23 {strides = array<i32>} : memref<16x32xbf16, #tpu.memory_space<vmem>>, vector<16x32xbf16>,
    return
  }
  func.func @transform_0(%arg0: i32) -> (i32, i32) {
    %c0_i32 = arith.constant 0 : i32
    %c0_i32_0 = arith.constant 0 : i32
    return %arg0, %c0_i32 : i32, i32
  }
  func.func @transform_1(%arg0: i32) -> (i32, i32) {
    %c0_i32 = arith.constant 0 : i32
    %c0_i32_0 = arith.constant 0 : i32
    %c0_i32_1 = arith.constant 0 : i32
    return %c0_i32, %c0_i32_0 : i32, i32
  }
  func.func @transform_2(%arg0: i32) -> (i32, i32) {
    %c0_i32 = arith.constant 0 : i32
    %c0_i32_0 = arith.constant 0 : i32
    %c0_i32_1 = arith.constant 0 : i32
    return %c0_i32, %c0_i32_0 : i32, i32
  }
  func.func @transform_3(%arg0: i32) -> (i32, i32) {
    %c0_i32 = arith.constant 0 : i32
    %c0_i32_0 = arith.constant 0 : i32
    return %arg0, %c0_i32 : i32, i32
  }
}

</mosaic_0001>

<bundles_post_ra>
// kernel: tpu_custom_call.1
= control target key start
LH: loop header
LB: loop body
LE: loop exit
PB: predicated region body
PF: predicated region fallthrough
CT: control target
= control target key end

     0   :  { %8 = vsyncpa [#allocation3], 0  ;;  %s229_s0 = inlined_call_operand.hbm [shape: f32[16,32], index: 0, kind: input, shape index: {}]   ;;  %s230_s1 = inlined_call_operand.vmem [shape: f32[1,32], index: 1, kind: input, shape index: {}]   ;;  %s231_s2 = inlined_call_operand.vmem [shape: f32[1,32], index: 2, kind: input, shape index: {}]   ;;  %s232_s3 = inlined_call_operand.hbm [shape: bf16[16,32], index: 3, kind: output, shape index: {}]  }
   0x1   :  { %9 = vsyncpa [#allocation4], 0  ;;  %s169_s12 = smov [#allocation2]   ;;  %s121_s16 = scalar_lea.hbm %s229_s0, 256 }
   0x2   :  { %s15_s13 = sshll.u32 %s169_s12, 4  ;;  %p122_p0 = scmp.ne.s32.totalorder %s229_s0, %s121_s16  ;;  %s16_s13 = int_to_ptr.vmem [resolvable:$true] %s15_s13 }
   0x3   :  { %p125_p1 = scmp.lt.u32.totalorder %s121_s16, %s229_s0 }
   0x5   :  { %p127_p2 = pnand %p125_p1, %p122_p0 }
   0x7   :  { %130 = shalt.err (!%p127_p2)
}
   0x8   :  { %s131_s21 = scalar_lea.vmem %s16_s13, 256  ;;  %p136_p4 = scmp.lt.s32.totalorder %s16_s13, %s16_s13 }
   0x9   :  { %p132_p3 = scmp.ne.s32.totalorder %s16_s13, %s131_s21  ;;  %p137_p5 = scmp.lt.s32.totalorder %s131_s21, %s131_s21 }
   0xb   :  { %p138_p6 = por %p137_p5, %p136_p4 }
   0xd   :  { %p139_p7 = pnand %p138_p6, %p132_p3 }
   0xf   :  { %142 = shalt.err (!%p139_p7)
}
  0x10   :  { %s170_s22 = smov 128   ;;  %s171_s23 = smov 8  }
  0x11   :  { %21 = dma.hbm_to_vmem [thread:$0]  %s229_s0, 256, %s16_s13, [#allocation3], %s170_s22, %s170_s22, %s171_s23  }
  0x12   :  { %165 = dma.done.wait [#allocation3], 256  }
  0x13   :  { %166 = vsyncadd [#allocation3], 4294967040  ;;  %vm31_vm0 = vcmask 261120   ;;  %v29_v0 = vld [vmem:[#allocation2] sm:$0xff]  ;;  %v30_v1 = vld [vmem:[#allocation2 + $0x8] sm:$0xff]  ;;  %vm85_vm1 = vcmask 257024  }
  0x14   :  { %v32_v2 = vsel %vm31_vm0, %v29_v0, 0.0  ;;  %v35_v3 = vsel %vm31_vm0, %v30_v1, 0.0  ;;  %v105_v21 = vld [vmem:[%s230_s1] ss:$0 sm:$0xff]  ;;  %s172_s29 = smov [#allocation5]  }
  0x15   :  { %33 = vadd.xlane.f32.xlu0 %v32_v2  ;;  %v106_v23 = vld [vmem:[%s231_s2] ss:$0 sm:$0xff]  ;;  %s93_s30 = sshll.u32 %s172_s29, 4  ;;  %s94_s30 = int_to_ptr.vmem [resolvable:$true] %s93_s30 }
  0x16   :  { %s143_s1 = scalar_lea.vmem %s94_s30, 128  ;;  %p148_p9 = scmp.lt.s32.totalorder %s94_s30, %s94_s30 }
  0x17   :  { %p144_p8 = scmp.ne.s32.totalorder %s94_s30, %s143_s1  ;;  %p149_p10 = scmp.lt.s32.totalorder %s143_s1, %s143_s1 }
  0x19   :  { %36 = vadd.xlane.f32.xlu0 %v35_v3  ;;  %p150_p11 = por %p149_p10, %p148_p9 }
  0x1b   :  { %p151_p12 = pnand %p150_p11, %p144_p8 }
  0xa2   :  { %v34_v4 = vpop.xlane.xlu0 %33 }
  0xa3   :  { %v39_v5 = vmul.f32 0.03125, %v34_v4 }
  0xa5   :  { %v41_v6 = vsub.f32 %v29_v0, %v39_v5 }
  0xa6   :  { %v37_v7 = vpop.xlane.xlu0 %36 }
  0xa7   :  { %v40_v8 = vmul.f32 0.03125, %v37_v7  ;;  %v43_v9 = vmul.f32 %v41_v6, %v41_v6 }
  0xa9   :  { %v42_v10 = vsub.f32 %v30_v1, %v40_v8  ;;  %v45_v11 = vsel %vm31_vm0, %v43_v9, 0.0 }
  0xaa   :  { %46 = vadd.xlane.f32.xlu1 %v45_v11 }
  0xab   :  { %v44_v12 = vmul.f32 %v42_v10, %v42_v10 }
  0xad   :  { %v48_v13 = vsel %vm31_vm0, %v44_v12, 0.0 }
  0xae   :  { %49 = vadd.xlane.f32.xlu1 %v48_v13 }
 0x137   :  { %v47_v14 = vpop.xlane.xlu1 %46 }
 0x138   :  { %v51_v15 = vmul.f32 0.03125, %v47_v14 }
 0x13a   :  { %v53_v16 = vadd.f32 1e-07, %v51_v15 }
 0x13b   :  { %v50_v17 = vpop.xlane.xlu1 %49 }
 0x13c   :  { %117 = vrsqrt.f32 %v53_v16  ;;  %v52_v18 = vmul.f32 0.03125, %v50_v17 }
 0x13e   :  { %v54_v19 = vadd.f32 1e-07, %v52_v18 }
 0x140   :  { %119 = vrsqrt.f32 %v54_v19 }
 0x146   :  { %v118_v20 = vpop.eup %117 }
 0x147   :  { %v57_v22 = vmul.f32 %v118_v20, %v41_v6 }
 0x149   :  { %v66_v24 = vmul.f32 %v105_v21, %v57_v22 }
 0x14a   :  { %v120_v25 = vpop.eup %119 }
 0x14b   :  { %v58_v26 = vmul.f32 %v120_v25, %v42_v10  ;;  %v75_v27 = vadd.f32 %v106_v23, %v66_v24 }
 0x14d   :  { %v67_v28 = vmul.f32 %v105_v21, %v58_v26  ;;  %v109_v29 = vpack.c.bf16 %v75_v27, %v75_v27 }
 0x14f   :  { %v76_v30 = vadd.f32 %v106_v23, %v67_v28  ;;  %86 = vst.msk [vmem:[#allocation5] sm:$0xf] %vm85_vm1, %v109_v29 }
 0x151   :  { %v110_v31 = vpack.c.bf16 %v76_v30, %v76_v30 }
 0x153   :  { %87 = vst.msk [vmem:[#allocation5 + $0x4] sm:$0xf] %vm85_vm1, %v110_v31 }
 0x154   :  { %154 = shalt.err (!%p151_p12)
}
 0x155   :  { %s155_s5 = scalar_lea.hbm %s232_s3, 128 }
 0x156   :  { %p156_p13 = scmp.ne.s32.totalorder %s232_s3, %s155_s5  ;;  %p159_p0 = scmp.lt.u32.totalorder %s155_s5, %s232_s3 }
 0x158   :  { %p161_p1 = pnand %p159_p0, %p156_p13 }
 0x15a   :  { %164 = shalt.err (!%p161_p1)
}
 0x15b   :  { %s173_s10 = smov 64   ;;  %s174_s11 = smov 4  }
 0x15c   :  { %99 = dma.vmem_to_hbm [thread:$0]  %s94_s30, 128, %s232_s3, [#allocation4], %s173_s10, %s173_s10, %s174_s11  }
 0x15d   :  { %167 = dma.done.wait [#allocation4], 128  }
 0x15e   :  { %168 = vsyncadd [#allocation4], 4294967168 }
 0x15f   :  { %103 = vsyncpa [#allocation3], 1 }
 0x160   :  { %104 = vsyncpa [#allocation4], 1 }

</bundles_post_ra>
